<compile_context>
chip_gen: v6e
topology: v6e:2x2x1
jax: 0.10.0
libtpu: 0.0.40
codegen_flags: <defaults>
</compile_context>

<pallas_src>
import functools

import jax
import jax.numpy as jnp
from jax import lax
from jax.experimental import pallas as pl
from jax.experimental.pallas import tpu as pltpu

# Below this total input size the XLA fused gather beats the pallas_call
# dispatch + per-step overhead (the module's own [4,5,6] test is ~480 B).
_SMALL_PROBLEM_BYTES = 256 * 1024
# Per-step budget for the (row_block, G) input block; double-buffered this
# stays well under the default scoped VMEM on v5e/v6e/v7x.
_MAX_BLOCK_BYTES = 4 * 1024 * 1024


def _round_up(n, m):
    return ((n + m - 1) // m) * m


def _index_select_lanes_kernel(idx_ref, x_ref, o_ref, *, num_indices, num_cols):
    """Select `num_indices` lanes (columns) of x_ref, indices in SMEM idx_ref."""
    x = x_ref[...]                                          # (R, G)
    lane = lax.broadcasted_iota(jnp.int32, x.shape, 1)      # lane ids, (R, G)
    cols = []
    for l in range(num_indices):                            # L is static (=2)
        # Clamp in-kernel (two scalar-ALU ops, free).  torch would raise on
        # out-of-range indices; we clamp instead of reading a wrong block.
        idx_l = jnp.clip(idx_ref[l], 0, num_cols - 1)
        sel = jnp.where(lane == idx_l, x, jnp.zeros_like(x))
        # One non-zero element per row -> the lane reduction is exact.
        cols.append(jnp.sum(sel, axis=1, keepdims=True))    # (R, 1)
    o_ref[...] = jnp.concatenate(cols, axis=1).astype(o_ref.dtype)


def index_select_dim2(x, indices, *, force_pallas=False, row_block=None):
    """Equivalent of torch.index_select(x, 2, indices) for x: [M, K, G]."""
    M, K, G = x.shape
    L = indices.shape[0]
    MK = M * K

    if L == 0:
        return jnp.zeros((M, K, 0), x.dtype)

    # ---- Small-problem fast path (review item 1). ----
    if not force_pallas and x.size * x.dtype.itemsize < _SMALL_PROBLEM_BYTES:
        return jnp.take(x, indices, axis=2)

    # Scalar prefetch wants int32 (no-op under default x32; truncation only
    # matters if x64 is enabled AND G exceeds int32 range).
    idx32 = indices.astype(jnp.int32)

    # Free layout change: [M,K,G] -> [M*K, G] (contiguous collapse, no copy).
    x2d = x.reshape(MK, G)

    itemsize = x.dtype.itemsize
    if row_block is None:
        r_cap = max(8, (_MAX_BLOCK_BYTES // max(1, G * itemsize)) // 8 * 8)
        row_block = min(_round_up(MK, 8), r_cap)
    row_block = max(8, _round_up(row_block, 8))
    num_tiles = pl.cdiv(MK, row_block)

    kernel = functools.partial(
        _index_select_lanes_kernel, num_indices=L, num_cols=G)

    out2d = pl.pallas_call(
        kernel,
        out_shape=jax.ShapeDtypeStruct((MK, L), x.dtype),
        grid_spec=pltpu.PrefetchScalarGridSpec(
            num_scalar_prefetch=1,
            grid=(num_tiles,),
            # Input block: full G on the lane axis (== array dim), row tile a
            # multiple of 8 -> (8,128) rule satisfied for any dynamic shape.
            in_specs=[pl.BlockSpec((row_block, G), lambda i, idx_ref: (i, 0))],
            # Output block is (row_block, L); L=2 lanes means masked stores,
            # but output traffic is O(M*K*L) -- negligible vs the input read.
            out_specs=pl.BlockSpec((row_block, L), lambda i, idx_ref: (i, 0)),
        ),
        compiler_params=pltpu.CompilerParams(
            dimension_semantics=("parallel",),       # row tiles independent
            vmem_limit_bytes=32 * 1024 * 1024,       # explicit, safe on v5e/v6e/v7x
        ),
    )(idx32, x2d)

    # Free layout change: [M*K, L] -> [M, K, L] (split of leading dim).
    return out2d.reshape(M, K, L)


def reference(x, indices):
    return jnp.take(x, indices, axis=2)


if __name__ == "__main__":
    key = jax.random.PRNGKey(0)
    kx, ki, kx2, ki2 = jax.random.split(key, 4)

    # 1) Module's annotated tiny shape [4,5,6] / indices [2]: auto-dispatch
    #    takes the jnp.take fast path.
    x_small = jax.random.normal(kx, (4, 5, 6), dtype=jnp.float32)
    idx = jax.random.randint(ki, (2,), 0, 6, dtype=jnp.int32)  # torch int64 -> int32 (x32)
    out_fast = jax.block_until_ready(index_select_dim2(x_small, idx))
    ref_small = reference(x_small, idx)
    assert out_fast.shape == (4, 5, 2) and out_fast.dtype == jnp.float32
    assert jnp.allclose(out_fast, ref_small), "fast path mismatch"

    # 2) Same tiny shape forced through the Pallas kernel (single tile).
    out_pk = jax.block_until_ready(
        index_select_dim2(x_small, idx, force_pallas=True))
    assert jnp.allclose(out_pk, ref_small), "pallas (tiny) mismatch"

    # 3) Moderate dynamic shape that takes the Pallas path on its own; small
    #    row_block exercises the multi-tile grid (MK=512 rows, 8 tiles of 64).
    x_med = jax.random.normal(kx2, (16, 32, 160), dtype=jnp.float32)
    idx2 = jax.random.randint(ki2, (2,), 0, 160, dtype=jnp.int32)
    out_med = jax.block_until_ready(index_select_dim2(x_med, idx2, row_block=64))
    ref_med = reference(x_med, idx2)
    assert out_med.shape == (16, 32, 2)
    assert jnp.allclose(out_med, ref_med), "pallas (multi-tile) mismatch"

    print("KERNEL_OK")
</pallas_src>

<mosaic_0001>
module attributes {stable_mosaic.version = 11 : i64} {
  func.func @_index_select_lanes_kernel(%arg0: i32, %arg1: memref<2xi32, #tpu.memory_space<smem>>, %arg2: memref<24x6xf32, #tpu.memory_space<vmem>>, %arg3: memref<24x2xf32, #tpu.memory_space<vmem>>) attributes {dimension_semantics = [#tpu.dimension_semantics<parallel>], iteration_bounds = array<i64: 1>, scalar_prefetch = 1 : i64, scratch_operands = 0 : i64, tpu.core_type = #tpu.core_type<tc>, window_params = [{transform_indices = @transform_0, window_bounds = array<i64: 24, 6>}, {transform_indices = @transform_1, window_bounds = array<i64: 24, 2>}]} {
    %c0 = arith.constant 0 : index
    %c0_0 = arith.constant 0 : index
    %0 = vector.load %arg2[%c0, %c0_0] : memref<24x6xf32, #tpu.memory_space<vmem>>, vector<24x6xf32>
    %1 = tpu.iota {dimensions = array<i32: 1>} : vector<24x6xi32>
    %c0_1 = arith.constant 0 : index
    %2 = memref.load %arg1[%c0_1] : memref<2xi32, #tpu.memory_space<smem>>
    %c0_i32 = arith.constant 0 : i32
    %c5_i32 = arith.constant 5 : i32
    %3 = arith.maxsi %c0_i32, %2 : i32
    %4 = arith.minsi %c5_i32, %3 : i32
    %5 = vector.broadcast %4 : i32 to vector<24x6xi32>
    %6 = arith.cmpi eq, %1, %5 : vector<24x6xi32>
    %cst = arith.constant 0.000000e+00 : f32
    %7 = vector.broadcast %cst : f32 to vector<24x6xf32>
    %8 = arith.select %6, %0, %7 : vector<24x6xi1>, vector<24x6xf32>
    %cst_2 = arith.constant dense<0.000000e+00> : vector<24xf32>
    %9 = vector.multi_reduction <add>, %8, %cst_2 [1] : vector<24x6xf32> to vector<24xf32>
    %10 = vector.shape_cast %9 : vector<24xf32> to vector<24x1xf32>
    %c1 = arith.constant 1 : index
    %11 = memref.load %arg1[%c1] : memref<2xi32, #tpu.memory_space<smem>>
    %c0_i32_3 = arith.constant 0 : i32
    %c5_i32_4 = arith.constant 5 : i32
    %12 = arith.maxsi %c0_i32_3, %11 : i32
    %13 = arith.minsi %c5_i32_4, %12 : i32
    %14 = vector.broadcast %13 : i32 to vector<24x6xi32>
    %15 = arith.cmpi eq, %1, %14 : vector<24x6xi32>
    %cst_5 = arith.constant 0.000000e+00 : f32
    %16 = vector.broadcast %cst_5 : f32 to vector<24x6xf32>
    %17 = arith.select %15, %0, %16 : vector<24x6xi1>, vector<24x6xf32>
    %cst_6 = arith.constant dense<0.000000e+00> : vector<24xf32>
    %18 = vector.multi_reduction <add>, %17, %cst_6 [1] : vector<24x6xf32> to vector<24xf32>
    %19 = vector.shape_cast %18 : vector<24xf32> to vector<24x1xf32>
    %20 = tpu.concatenate %10, %19 in 1 : vector<24x1xf32>, vector<24x1xf32> -> vector<24x2xf32>
    %c0_7 = arith.constant 0 : index
    %c0_8 = arith.constant 0 : index
    %21 = vector.load %arg3[%c0_7, %c0_8] : memref<24x2xf32, #tpu.memory_space<vmem>>, vector<24x2xf32>
    tpu.vector_store %arg3[%c0_7, %c0_8], %20 {strides = array<i32>} : memref<24x2xf32, #tpu.memory_space<vmem>>, vector<24x2xf32>,
    return
  }
  func.func @transform_0(%arg0: i32, %arg1: memref<2xi32, #tpu.memory_space<smem>>) -> (i32, i32) {
    %c0_i32 = arith.constant 0 : i32
    %c0_i32_0 = arith.constant 0 : i32
    return %arg0, %c0_i32 : i32, i32
  }
  func.func @transform_1(%arg0: i32, %arg1: memref<2xi32, #tpu.memory_space<smem>>) -> (i32, i32) {
    %c0_i32 = arith.constant 0 : i32
    %c0_i32_0 = arith.constant 0 : i32
    return %arg0, %c0_i32 : i32, i32
  }
}

</mosaic_0001>

<bundles_post_ra>
// kernel: tpu_custom_call.1
= control target key start
LH: loop header
LB: loop body
LE: loop exit
PB: predicated region body
PF: predicated region fallthrough
CT: control target
= control target key end

     0   :  { %s144_s0 = inlined_call_operand.vmem [shape: s32[2], index: 0, kind: input, shape index: {}]   ;;  %s145_s1 = inlined_call_operand.vmem [shape: f32[20,6], index: 1, kind: input, shape index: {}]   ;;  %s146_s2 = inlined_call_operand.vmem [shape: f32[20,2], index: 2, kind: output, shape index: {}]  }
   0x1   :  { %s7_s11 = sshll.u32 %s144_s0, 4  ;;  %s8_s11 = int_to_ptr.vmem [resolvable:$true] %s7_s11 }
   0x2   :  { %s87_s12 = scalar_lea.vmem %s8_s11, 16  ;;  %p92_p1 = scmp.lt.s32.totalorder %s8_s11, %s8_s11 }
   0x3   :  { %p88_p0 = scmp.ne.s32.totalorder %s8_s11, %s87_s12  ;;  %p93_p2 = scmp.lt.s32.totalorder %s87_s12, %s87_s12 }
   0x5   :  { %p94_p3 = por %p93_p2, %p92_p1 }
   0x7   :  { %p95_p4 = pnand %p94_p3, %p88_p0 }
   0x9   :  { %98 = shalt.err (!%p95_p4)  }
   0xa   :  { %s101_s13 = smov [#allocation3]  }
   0xb   :  { %10 = dma.vmem_to_smem %s8_s11, 16, %s101_s13, [#allocation2] }
   0xc   :  { %99 = dma.done.wait [#allocation2], 16 }
   0xd   :  { %100 = vsyncadd [#allocation2], 4294967280 }
   0xe   :  { %12 = sfence }
   0xf   :  { %s20_s14 = sld [smem:[#allocation3]]  ;;  %v18_v0 = vlaneseq  ;;  %v17_v2 = vld [vmem:[%s145_s1 + $0x10] sm:$0xff]  ;;  %v15_v3 = vld [vmem:[%s145_s1] sm:$0xff]  ;;  %v16_v4 = vld [vmem:[%s145_s1 + $0x8] sm:$0xff]  ;;  %vm30_vm0 = vcmask 48128   ;;  %vm59_vm3 = vcmask 7168  }
  0x10   :  { %s76_s15 = sld [smem:[#allocation3 + $0x1]]  ;;  %vm63_vm4 = vcmask 15360  }
  0x11   :  { %v19_v1 = vand.u32 127, %v18_v0 }
  0x15   :  { %p21_p5 = scmp.gt.s32.totalorder %s20_s14, 0  ;;  %p71_p6 = scmp.lt.s32.totalorder %s20_s14, 5 }
  0x16   :  { %p41_p7 = scmp.gt.s32.totalorder %s76_s15, 0  ;;  %p77_p8 = scmp.lt.s32.totalorder %s76_s15, 5 }
  0x17   :  { %s148_s14 = smov (!%p21_p5, %s20_s14), 0 }
  0x18   :  { %s150_s15 = smov (!%p41_p7, %s76_s15), 0  ;;  %s152_s14 = smov (!%p71_p6, %s148_s14), 5 }
  0x19   :  { %s154_s15 = smov (!%p77_p8, %s150_s15), 5  ;;  %v25_v5 = vstv %s152_s14 }
  0x1a   :  { %vm26_vm1 = vcmp.eq.s32.totalorder %v19_v1, %v25_v5  ;;  %v45_v6 = vstv %s154_s15 }
  0x1b   :  { %v29_v7 = vsel %vm26_vm1, %v17_v2, 0.0  ;;  %v27_v8 = vsel %vm26_vm1, %v15_v3, 0.0  ;;  %vm46_vm2 = vcmp.eq.s32.totalorder %v19_v1, %v45_v6  ;;  %v28_v9 = vsel %vm26_vm1, %v16_v4, 0.0 }
  0x1c   :  { %v37_v10 = vsel %vm30_vm0, %v29_v7, 0.0  ;;  %v31_v11 = vsel %vm30_vm0, %v27_v8, 0.0  ;;  %v47_v12 = vsel %vm46_vm2, %v15_v3, 0.0  ;;  %v34_v14 = vsel %vm30_vm0, %v28_v9, 0.0 }
  0x1d   :  { %38 = vadd.xlane.f32.xlu1 %v37_v10  ;;  %32 = vadd.xlane.f32.xlu0 %v31_v11  ;;  %v50_v13 = vsel %vm30_vm0, %v47_v12, 0.0  ;;  %v49_v15 = vsel %vm46_vm2, %v17_v2, 0.0  ;;  %v48_v16 = vsel %vm46_vm2, %v16_v4, 0.0 }
  0x1e   :  { %v56_v17 = vsel %vm30_vm0, %v49_v15, 0.0  ;;  %v53_v18 = vsel %vm30_vm0, %v48_v16, 0.0 }
  0x21   :  { %51 = vadd.xlane.f32.xlu1 %v50_v13  ;;  %35 = vadd.xlane.f32.xlu0 %v34_v14 }
  0x25   :  { %57 = vadd.xlane.f32.xlu1 %v56_v17  ;;  %54 = vadd.xlane.f32.xlu0 %v53_v18 }
  0xa6   :  { %v39_v19 = vpop.xlane.xlu1 %38  ;;  %v33_v20 = vpop.xlane.xlu0 %32 }
  0xaa   :  { %v52_v21 = vpop.xlane.xlu1 %51  ;;  %v36_v22 = vpop.xlane.xlu0 %35 }
  0xab   :  { %v60_v23 = vsel %vm59_vm3, %v33_v20, %v52_v21 }
  0xac   :  { %64 = vst.msk [vmem:[%s146_s2] sm:$0xff] %vm63_vm4, %v60_v23 }
  0xae   :  { %v58_v24 = vpop.xlane.xlu1 %57  ;;  %v55_v25 = vpop.xlane.xlu0 %54 }
  0xaf   :  { %v62_v26 = vsel %vm59_vm3, %v39_v19, %v58_v24  ;;  %v61_v27 = vsel %vm59_vm3, %v36_v22, %v55_v25 }
  0xb0   :  { %66 = vst.msk [vmem:[%s146_s2 + $0x10] sm:$0xff] %vm63_vm4, %v62_v26  ;;  %65 = vst.msk [vmem:[%s146_s2 + $0x8] sm:$0xff] %vm63_vm4, %v61_v27 }

</bundles_post_ra>
